<compile_context>
chip_gen: v5e
topology: v5e:2x2
jax: 0.10.0
libtpu: 0.0.40
codegen_flags: <defaults>
</compile_context>

<pallas_src>
import functools

import jax
import jax.numpy as jnp
from jax.experimental import pallas as pl
from jax.experimental.pallas import tpu as pltpu


def _round_up(x, m):
    return ((x + m - 1) // m) * m


def _cl_kernel(x_ref, w1_ref, w2_ref, h_ref, z_ref, acc_ref, *, inv_k, k_rem):
    """Fused mean-pool bag encoder + 2-layer projection head.

    Grid: (n, k) -- n over bag tiles ("parallel"), k over patch tiles ("arbitrary", last).
    x_ref : (TN, TK, F)  patch-feature tile
    w1_ref: (F, F)       first projection weight (in, out), VMEM-resident
    w2_ref: (F, P)       second projection weight (in, out), VMEM-resident
    h_ref : (TN, F)      bag-embedding output tile
    z_ref : (TN, P)      projection output tile
    acc_ref: (TN, F) f32 running patch sum (scratch, persists across k)
    """
    k = pl.program_id(1)
    nk = pl.num_programs(1)

    @pl.when(k == 0)
    def _():
        acc_ref[...] = jnp.zeros_like(acc_ref)

    if k_rem == 0:
        # Every patch tile is full; widen inside the reduction (no f32 temp tile).
        acc_ref[...] += jnp.sum(x_ref[...], axis=1, dtype=jnp.float32)
    else:
        @pl.when(k < nk - 1)
        def _():
            acc_ref[...] += jnp.sum(x_ref[...], axis=1, dtype=jnp.float32)

        @pl.when(k == nk - 1)
        def _():
            # Ragged last tile: only the first k_rem patch rows are valid; the
            # rest of the VMEM buffer holds unspecified boundary data.
            acc_ref[...] += jnp.sum(x_ref[:, :k_rem, :], axis=1, dtype=jnp.float32)

    @pl.when(k == nk - 1)
    def _():
        h = acc_ref[...] * inv_k                                   # (TN, F) f32 mean
        h_ref[...] = h.astype(h_ref.dtype)
        # Projection head on the MXU: native-dtype operands, f32 accumulation.
        hid = jnp.dot(h.astype(w1_ref.dtype), w1_ref[...],
                      preferred_element_type=jnp.float32)          # (TN, F)
        hid = jnp.maximum(hid, 0.0)                                # ReLU
        z = jnp.dot(hid.astype(w2_ref.dtype), w2_ref[...],
                    preferred_element_type=jnp.float32)            # (TN, P)
        z_ref[...] = z.astype(z_ref.dtype)


def cl_forward(x_nkf, w1_io, w2_io, *, x_tile_bytes=None):
    """Fused mean-pool encoder + projection head for a stack of bags (all views).

    Args:
      x_nkf : (N, K, F) stacked patch features, N = n_views * batch.
      w1_io : (F, F)    first linear weight, laid out (in, out).
      w2_io : (F, P)    second linear weight, laid out (in, out).
    Returns:
      (z, h): z (N, P) projections, h (N, F) bag embeddings.
    """
    N, K, F = x_nkf.shape
    P = w2_io.shape[1]
    out_dtype = x_nkf.dtype
    x_itemsize = jnp.dtype(x_nkf.dtype).itemsize
    w_itemsize = jnp.dtype(w1_io.dtype).itemsize
    out_itemsize = jnp.dtype(out_dtype).itemsize

    try:
        phys_vmem = int(pltpu.get_tpu_info().vmem_capacity_bytes)
    except Exception:
        phys_vmem = 64 << 20   # conservative fallback (v7x per-TC VMEM)

    if x_tile_bytes is None:
        # Larger tiles amortize per-grid-step overhead; v5e/v6e (128 MiB VMEM)
        # afford ~12 MiB per x buffer, v7x (64 MiB) ~6 MiB.
        x_tile_bytes = (12 << 20) if phys_vmem >= (100 << 20) else (6 << 20)

    # Bag-tile size: multiple of 8 sublanes, up to 256 rows for MXU fill at
    # large N, and >=2 tiles on the "parallel" axis so both v7x cores stay busy.
    TN = min(256, _round_up(N, 8))
    if N >= 16 and pl.cdiv(N, TN) < 2:
        TN = _round_up(pl.cdiv(N, 2), 8)

    # Patch-tile size: dtype-aware sublane multiple (8 f32 / 16 bf16 / 32 int8),
    # sized to x_tile_bytes and capped so double-buffered x + single-buffered
    # weights + outputs + accumulator fit physical VMEM with headroom.
    sub = max(8, 32 // x_itemsize)
    row_bytes = TN * F * x_itemsize
    fixed_bytes = ((F * F + F * P) * w_itemsize            # single-buffered weights
                   + 2 * TN * (F + P) * out_itemsize       # double-buffered outputs
                   + TN * F * 4)                            # f32 accumulator
    headroom = 4 << 20
    avail_for_x = max(1 << 20, phys_vmem - fixed_bytes - headroom)
    tk = min(x_tile_bytes // row_bytes, (avail_for_x // 2) // row_bytes)
    tk = max(sub, (tk // sub) * sub)
    TK = int(min(_round_up(K, sub), tk))

    grid = (pl.cdiv(N, TN), pl.cdiv(K, TK))
    k_rem = K % TK   # static; 0 means every patch tile is full

    vmem_need = 2 * TN * TK * F * x_itemsize + fixed_bytes
    # Allow for double-buffered weights too (fallback path), capped at physical VMEM.
    vmem_limit = int(min(phys_vmem,
                         max(16 << 20,
                             vmem_need + (F * F + F * P) * w_itemsize + headroom)))

    cost = pl.CostEstimate(
        flops=2 * N * F * F + 2 * N * F * P + N * K * F,
        transcendentals=0,
        bytes_accessed=(N * K * F * x_itemsize
                        + (F * F + F * P) * w_itemsize
                        + N * (F + P) * out_itemsize),
    )

    kernel = functools.partial(_cl_kernel, inv_k=1.0 / K, k_rem=k_rem)

    def build(single_buffer_weights):
        # Constant-index weights: request single buffering to reclaim VMEM.
        w_kwargs = ({"pipeline_mode": pl.Buffered(1)}
                    if single_buffer_weights else {})
        return pl.pallas_call(
            kernel,
            out_shape=(jax.ShapeDtypeStruct((N, F), out_dtype),
                       jax.ShapeDtypeStruct((N, P), out_dtype)),
            grid_spec=pltpu.PrefetchScalarGridSpec(
                num_scalar_prefetch=0,
                grid=grid,
                in_specs=[
                    pl.BlockSpec((TN, TK, F), lambda n, k: (n, k, 0)),
                    pl.BlockSpec((F, F), lambda n, k: (0, 0), **w_kwargs),
                    pl.BlockSpec((F, P), lambda n, k: (0, 0), **w_kwargs),
                ],
                out_specs=[
                    pl.BlockSpec((TN, F), lambda n, k: (n, 0)),
                    pl.BlockSpec((TN, P), lambda n, k: (n, 0)),
                ],
                scratch_shapes=[pltpu.VMEM((TN, F), jnp.float32)],
            ),
            compiler_params=pltpu.CompilerParams(
                dimension_semantics=("parallel", "arbitrary"),
                vmem_limit_bytes=vmem_limit,
            ),
            cost_estimate=cost,
        )

    try:
        h, z = build(True)(x_nkf, w1_io, w2_io)
    except Exception:
        # Robustness fallback for JAX versions without BlockSpec(pipeline_mode=...).
        h, z = build(False)(x_nkf, w1_io, w2_io)

    return z, h


class CLPallas:
    """JAX/Pallas equivalent of the PyTorch CL module (forward pass only)."""

    def __init__(self, projection_dim, n_features, key):
        self.n_features = n_features
        self.projection_dim = projection_dim
        k1, k2 = jax.random.split(key)
        bound = 1.0 / (n_features ** 0.5)
        # PyTorch stores weight as [out, in]; keep that convention then transpose once.
        w1_oi = jax.random.uniform(k1, (n_features, n_features),
                                   minval=-bound, maxval=bound, dtype=jnp.float32)
        w2_oi = jax.random.uniform(k2, (projection_dim, n_features),
                                   minval=-bound, maxval=bound, dtype=jnp.float32)
        self.w1_io = jnp.transpose(w1_oi)   # (F, F)  in->out
        self.w2_io = jnp.transpose(w2_oi)   # (F, P)  in->out

    def __call__(self, views_data_list):
        """views_data_list: list of (features_list, adj_mats_list) per view."""
        # TODO(synk): the reference encoder is an injected external module (e.g. a
        # graph-attention MIL encoder consuming adj_mats); a mean-pooling bag encoder
        # stands in for it here and adjacency matrices are ignored.  Bags are assumed
        # to share one patch count K (ragged bags would need a scalar-prefetched
        # per-bag valid count as the mean divisor).
        n_views = len(views_data_list)
        B = len(views_data_list[0][0])
        # One stack over every bag from every view -> (V*B, K, F); avoids the
        # previous per-view stack + concatenate copies.
        all_feats = [f for feats, _adj in views_data_list for f in feats]
        x_all = jnp.stack(all_feats, axis=0)

        # One fused pallas_call for all views: weights stay VMEM-resident.
        z_all, h_all = cl_forward(x_all, self.w1_io, self.w2_io)

        z_projections = [z_all[v * B:(v + 1) * B] for v in range(n_views)]
        h_bag_embeddings = [h_all[v * B:(v + 1) * B] for v in range(n_views)]
        return z_projections, h_bag_embeddings


if __name__ == "__main__":
    key = jax.random.PRNGKey(0)
    k_model, k_v1, k_v2 = jax.random.split(key, 3)

    # Small shapes; K=10 deliberately exercises the ragged-K (k_rem) path.
    B, K, F, P = 2, 10, 32, 16   # batch of WSIs, patches/WSI, n_features, projection_dim
    model = CLPallas(projection_dim=P, n_features=F, key=k_model)

    # Two views, each: list of per-WSI patch feature tensors [K, F], adjacency None.
    v1_feats = [jax.random.normal(jax.random.fold_in(k_v1, i), (K, F), jnp.float32)
                for i in range(B)]
    v2_feats = [jax.random.normal(jax.random.fold_in(k_v2, i), (K, F), jnp.float32)
                for i in range(B)]
    views_data_list = [
        (v1_feats, [None] * B),
        (v2_feats, [None] * B),
    ]

    z_projections, h_bag_embeddings = model(views_data_list)
    jax.block_until_ready(z_projections)
    jax.block_until_ready(h_bag_embeddings)

    # Sanity check against a pure-JAX reference.
    for (feats, _), z, h in zip(views_data_list, z_projections, h_bag_embeddings):
        x = jnp.stack(feats, axis=0)
        h_ref = jnp.mean(x, axis=1)
        z_ref = jnp.maximum(h_ref @ model.w1_io, 0.0) @ model.w2_io
        assert h.shape == (B, F) and z.shape == (B, P)
        assert jnp.allclose(h, h_ref, atol=1e-5)
        assert jnp.allclose(z, z_ref, atol=1e-4)

    print("KERNEL_OK")
</pallas_src>

<mosaic_0001>
module attributes {stable_mosaic.version = 11 : i64} {
  func.func @_cl_kernel(%arg0: i32, %arg1: i32, %arg2: memref<8x16x32xf32, #tpu.memory_space<vmem>>, %arg3: memref<32x32xf32, #tpu.memory_space<vmem>>, %arg4: memref<32x16xf32, #tpu.memory_space<vmem>>, %arg5: memref<8x32xf32, #tpu.memory_space<vmem>>, %arg6: memref<8x16xf32, #tpu.memory_space<vmem>>, %arg7: memref<8x32xf32, #tpu.memory_space<vmem>>) attributes {dimension_semantics = [#tpu.dimension_semantics<parallel>, #tpu.dimension_semantics<arbitrary>], iteration_bounds = array<i64: 1, 1>, scalar_prefetch = 0 : i64, scratch_operands = 1 : i64, tpu.core_type = #tpu.core_type<tc>, window_params = [{transform_indices = @transform_0, window_bounds = array<i64: 8, 16, 32>}, {pipeline_mode = #tpu.pipeline_mode<synchronous>, transform_indices = @transform_1, window_bounds = array<i64: 32, 32>}, {pipeline_mode = #tpu.pipeline_mode<synchronous>, transform_indices = @transform_2, window_bounds = array<i64: 32, 16>}, {transform_indices = @transform_3, window_bounds = array<i64: 8, 32>}, {transform_indices = @transform_4, window_bounds = array<i64: 8, 16>}]} {
    %c0_i32 = arith.constant 0 : i32
    %0 = arith.cmpi eq, %arg1, %c0_i32 : i32
    %1 = arith.extui %0 : i1 to i32
    %c0_i32_0 = arith.constant 0 : i32
    %2 = arith.cmpi ne, %1, %c0_i32_0 : i32
    scf.if %2 {
      %cst = arith.constant 0.000000e+00 : f32
      %12 = vector.broadcast %cst : f32 to vector<8x32xf32>
      %c0 = arith.constant 0 : index
      %c0_7 = arith.constant 0 : index
      %13 = vector.load %arg7[%c0, %c0_7] : memref<8x32xf32, #tpu.memory_space<vmem>>, vector<8x32xf32>
      tpu.vector_store %arg7[%c0, %c0_7], %12 {strides = array<i32>} : memref<8x32xf32, #tpu.memory_space<vmem>>, vector<8x32xf32>,
    } else {
    }
    %c0_i32_1 = arith.constant 0 : i32
    %3 = arith.cmpi slt, %arg1, %c0_i32_1 : i32
    %4 = arith.extui %3 : i1 to i32
    %c0_i32_2 = arith.constant 0 : i32
    %5 = arith.cmpi ne, %4, %c0_i32_2 : i32
    scf.if %5 {
      %c0 = arith.constant 0 : index
      %c0_7 = arith.constant 0 : index
      %12 = vector.load %arg7[%c0, %c0_7] : memref<8x32xf32, #tpu.memory_space<vmem>>, vector<8x32xf32>
      %c0_8 = arith.constant 0 : index
      %c0_9 = arith.constant 0 : index
      %c0_10 = arith.constant 0 : index
      %13 = vector.load %arg2[%c0_8, %c0_9, %c0_10] : memref<8x16x32xf32, #tpu.memory_space<vmem>>, vector<8x16x32xf32>
      %cst = arith.constant dense<0.000000e+00> : vector<8x32xf32>
      %14 = vector.multi_reduction <add>, %13, %cst [1] : vector<8x16x32xf32> to vector<8x32xf32>
      %15 = arith.addf %12, %14 : vector<8x32xf32>
      %c0_11 = arith.constant 0 : index
      %c0_12 = arith.constant 0 : index
      %16 = vector.load %arg7[%c0_11, %c0_12] : memref<8x32xf32, #tpu.memory_space<vmem>>, vector<8x32xf32>
      tpu.vector_store %arg7[%c0_11, %c0_12], %15 {strides = array<i32>} : memref<8x32xf32, #tpu.memory_space<vmem>>, vector<8x32xf32>,
    } else {
    }
    %c0_i32_3 = arith.constant 0 : i32
    %6 = arith.cmpi eq, %arg1, %c0_i32_3 : i32
    %7 = arith.extui %6 : i1 to i32
    %c0_i32_4 = arith.constant 0 : i32
    %8 = arith.cmpi ne, %7, %c0_i32_4 : i32
    scf.if %8 {
      %c0 = arith.constant 0 : index
      %c0_7 = arith.constant 0 : index
      %12 = vector.load %arg7[%c0, %c0_7] : memref<8x32xf32, #tpu.memory_space<vmem>>, vector<8x32xf32>
      %c0_8 = arith.constant 0 : index
      %c0_9 = arith.constant 0 : index
      %c0_10 = arith.constant 0 : index
      %13 = vector.load %arg2[%c0_8, %c0_9, %c0_10] : memref<8x16x32xf32, #tpu.memory_space<vmem>>, vector<8x10x32xf32>
      %cst = arith.constant dense<0.000000e+00> : vector<8x32xf32>
      %14 = vector.multi_reduction <add>, %13, %cst [1] : vector<8x10x32xf32> to vector<8x32xf32>
      %15 = arith.addf %12, %14 : vector<8x32xf32>
      %c0_11 = arith.constant 0 : index
      %c0_12 = arith.constant 0 : index
      %16 = vector.load %arg7[%c0_11, %c0_12] : memref<8x32xf32, #tpu.memory_space<vmem>>, vector<8x32xf32>
      tpu.vector_store %arg7[%c0_11, %c0_12], %15 {strides = array<i32>} : memref<8x32xf32, #tpu.memory_space<vmem>>, vector<8x32xf32>,
    } else {
    }
    %c0_i32_5 = arith.constant 0 : i32
    %9 = arith.cmpi eq, %arg1, %c0_i32_5 : i32
    %10 = arith.extui %9 : i1 to i32
    %c0_i32_6 = arith.constant 0 : i32
    %11 = arith.cmpi ne, %10, %c0_i32_6 : i32
    scf.if %11 {
      %c0 = arith.constant 0 : index
      %c0_7 = arith.constant 0 : index
      %12 = vector.load %arg7[%c0, %c0_7] : memref<8x32xf32, #tpu.memory_space<vmem>>, vector<8x32xf32>
      %cst = arith.constant 1.000000e-01 : f32
      %13 = vector.broadcast %cst : f32 to vector<8x32xf32>
      %14 = arith.mulf %12, %13 : vector<8x32xf32>
      %c0_8 = arith.constant 0 : index
      %c0_9 = arith.constant 0 : index
      %15 = vector.load %arg5[%c0_8, %c0_9] : memref<8x32xf32, #tpu.memory_space<vmem>>, vector<8x32xf32>
      tpu.vector_store %arg5[%c0_8, %c0_9], %14 {strides = array<i32>} : memref<8x32xf32, #tpu.memory_space<vmem>>, vector<8x32xf32>,
      %c0_10 = arith.constant 0 : index
      %c0_11 = arith.constant 0 : index
      %16 = vector.load %arg3[%c0_10, %c0_11] : memref<32x32xf32, #tpu.memory_space<vmem>>, vector<32x32xf32>
      %cst_12 = arith.constant dense<0.000000e+00> : vector<8x32xf32>
      %17 = tpu.matmul %14, %16, %cst_12 {dimension_numbers = #tpu.dot_dimension_numbers<[1], [0], [0], [1], [0, 0, 1, 1], [], []>} : vector<8x32xf32>, vector<32x32xf32>, vector<8x32xf32> -> vector<8x32xf32>
      %cst_13 = arith.constant 0.000000e+00 : f32
      %18 = vector.broadcast %cst_13 : f32 to vector<8x32xf32>
      %19 = arith.maximumf %17, %18 : vector<8x32xf32>
      %c0_14 = arith.constant 0 : index
      %c0_15 = arith.constant 0 : index
      %20 = vector.load %arg4[%c0_14, %c0_15] : memref<32x16xf32, #tpu.memory_space<vmem>>, vector<32x16xf32>
      %cst_16 = arith.constant dense<0.000000e+00> : vector<8x16xf32>
      %21 = tpu.matmul %19, %20, %cst_16 {dimension_numbers = #tpu.dot_dimension_numbers<[1], [0], [0], [1], [0, 0, 1, 1], [], []>} : vector<8x32xf32>, vector<32x16xf32>, vector<8x16xf32> -> vector<8x16xf32>
      %c0_17 = arith.constant 0 : index
      %c0_18 = arith.constant 0 : index
      %22 = vector.load %arg6[%c0_17, %c0_18] : memref<8x16xf32, #tpu.memory_space<vmem>>, vector<8x16xf32>
      tpu.vector_store %arg6[%c0_17, %c0_18], %21 {strides = array<i32>} : memref<8x16xf32, #tpu.memory_space<vmem>>, vector<8x16xf32>,
    } else {
    }
    return
  }
  func.func @transform_0(%arg0: i32, %arg1: i32) -> (i32, i32, i32) {
    %c0_i32 = arith.constant 0 : i32
    %c0_i32_0 = arith.constant 0 : i32
    return %arg0, %arg1, %c0_i32 : i32, i32, i32
  }
  func.func @transform_1(%arg0: i32, %arg1: i32) -> (i32, i32) {
    %c0_i32 = arith.constant 0 : i32
    %c0_i32_0 = arith.constant 0 : i32
    %c0_i32_1 = arith.constant 0 : i32
    return %c0_i32, %c0_i32_0 : i32, i32
  }
  func.func @transform_2(%arg0: i32, %arg1: i32) -> (i32, i32) {
    %c0_i32 = arith.constant 0 : i32
    %c0_i32_0 = arith.constant 0 : i32
    %c0_i32_1 = arith.constant 0 : i32
    return %c0_i32, %c0_i32_0 : i32, i32
  }
  func.func @transform_3(%arg0: i32, %arg1: i32) -> (i32, i32) {
    %c0_i32 = arith.constant 0 : i32
    %c0_i32_0 = arith.constant 0 : i32
    return %arg0, %c0_i32 : i32, i32
  }
  func.func @transform_4(%arg0: i32, %arg1: i32) -> (i32, i32) {
    %c0_i32 = arith.constant 0 : i32
    %c0_i32_0 = arith.constant 0 : i32
    return %arg0, %c0_i32 : i32, i32
  }
}

module attributes {stable_mosaic.version = 11 : i64} {
  func.func @_cl_kernel(%arg0: i32, %arg1: i32, %arg2: memref<8x16x32xf32, #tpu.memory_space<vmem>>, %arg3: memref<32x32xf32, #tpu.memory_space<vmem>>, %arg4: memref<32x16xf32, #tpu.memory_space<vmem>>, %arg5: memref<8x32xf32, #tpu.memory_space<vmem>>, %arg6: memref<8x16xf32, #tpu.memory_space<vmem>>, %arg7: memref<8x32xf32, #tpu.memory_space<vmem>>) attributes {dimension_semantics = [#tpu.dimension_semantics<parallel>, #tpu.dimension_semantics<arbitrary>], iteration_bounds = array<i64: 1, 1>, scalar_prefetch = 0 : i64, scratch_operands = 1 : i64, tpu.core_type = #tpu.core_type<tc>, window_params = [{transform_indices = @transform_0, window_bounds = array<i64: 8, 16, 32>}, {pipeline_mode = #tpu.pipeline_mode<synchronous>, transform_indices = @transform_1, window_bounds = array<i64: 32, 32>}, {pipeline_mode = #tpu.pipeline_mode<synchronous>, transform_indices = @transform_2, window_bounds = array<i64: 32, 16>}, {transform_indices = @transform_3, window_bounds = array<i64: 8, 32>}, {transform_indices = @transform_4, window_bounds = array<i64: 8, 16>}]} {
    %c0_i32 = arith.constant 0 : i32
    %0 = arith.cmpi eq, %arg1, %c0_i32 : i32
    %1 = arith.extui %0 : i1 to i32
    %c0_i32_0 = arith.constant 0 : i32
    %2 = arith.cmpi ne, %1, %c0_i32_0 : i32
    scf.if %2 {
      %cst = arith.constant 0.000000e+00 : f32
      %12 = vector.broadcast %cst : f32 to vector<8x32xf32>
      %c0 = arith.constant 0 : index
      %c0_7 = arith.constant 0 : index
      %13 = vector.load %arg7[%c0, %c0_7] : memref<8x32xf32, #tpu.memory_space<vmem>>, vector<8x32xf32>
      tpu.vector_store %arg7[%c0, %c0_7], %12 {strides = array<i32>} : memref<8x32xf32, #tpu.memory_space<vmem>>, vector<8x32xf32>,
    } else {
    }
    %c0_i32_1 = arith.constant 0 : i32
    %3 = arith.cmpi slt, %arg1, %c0_i32_1 : i32
    %4 = arith.extui %3 : i1 to i32
    %c0_i32_2 = arith.constant 0 : i32
    %5 = arith.cmpi ne, %4, %c0_i32_2 : i32
    scf.if %5 {
      %c0 = arith.constant 0 : index
      %c0_7 = arith.constant 0 : index
      %12 = vector.load %arg7[%c0, %c0_7] : memref<8x32xf32, #tpu.memory_space<vmem>>, vector<8x32xf32>
      %c0_8 = arith.constant 0 : index
      %c0_9 = arith.constant 0 : index
      %c0_10 = arith.constant 0 : index
      %13 = vector.load %arg2[%c0_8, %c0_9, %c0_10] : memref<8x16x32xf32, #tpu.memory_space<vmem>>, vector<8x16x32xf32>
      %cst = arith.constant dense<0.000000e+00> : vector<8x32xf32>
      %14 = vector.multi_reduction <add>, %13, %cst [1] : vector<8x16x32xf32> to vector<8x32xf32>
      %15 = arith.addf %12, %14 : vector<8x32xf32>
      %c0_11 = arith.constant 0 : index
      %c0_12 = arith.constant 0 : index
      %16 = vector.load %arg7[%c0_11, %c0_12] : memref<8x32xf32, #tpu.memory_space<vmem>>, vector<8x32xf32>
      tpu.vector_store %arg7[%c0_11, %c0_12], %15 {strides = array<i32>} : memref<8x32xf32, #tpu.memory_space<vmem>>, vector<8x32xf32>,
    } else {
    }
    %c0_i32_3 = arith.constant 0 : i32
    %6 = arith.cmpi eq, %arg1, %c0_i32_3 : i32
    %7 = arith.extui %6 : i1 to i32
    %c0_i32_4 = arith.constant 0 : i32
    %8 = arith.cmpi ne, %7, %c0_i32_4 : i32
    scf.if %8 {
      %c0 = arith.constant 0 : index
      %c0_7 = arith.constant 0 : index
      %12 = vector.load %arg7[%c0, %c0_7] : memref<8x32xf32, #tpu.memory_space<vmem>>, vector<8x32xf32>
      %c0_8 = arith.constant 0 : index
      %c0_9 = arith.constant 0 : index
      %c0_10 = arith.constant 0 : index
      %13 = vector.load %arg2[%c0_8, %c0_9, %c0_10] : memref<8x16x32xf32, #tpu.memory_space<vmem>>, vector<8x10x32xf32>
      %cst = arith.constant dense<0.000000e+00> : vector<8x32xf32>
      %14 = vector.multi_reduction <add>, %13, %cst [1] : vector<8x10x32xf32> to vector<8x32xf32>
      %15 = arith.addf %12, %14 : vector<8x32xf32>
      %c0_11 = arith.constant 0 : index
      %c0_12 = arith.constant 0 : index
      %16 = vector.load %arg7[%c0_11, %c0_12] : memref<8x32xf32, #tpu.memory_space<vmem>>, vector<8x32xf32>
      tpu.vector_store %arg7[%c0_11, %c0_12], %15 {strides = array<i32>} : memref<8x32xf32, #tpu.memory_space<vmem>>, vector<8x32xf32>,
    } else {
    }
    %c0_i32_5 = arith.constant 0 : i32
    %9 = arith.cmpi eq, %arg1, %c0_i32_5 : i32
    %10 = arith.extui %9 : i1 to i32
    %c0_i32_6 = arith.constant 0 : i32
    %11 = arith.cmpi ne, %10, %c0_i32_6 : i32
    scf.if %11 {
      %c0 = arith.constant 0 : index
      %c0_7 = arith.constant 0 : index
      %12 = vector.load %arg7[%c0, %c0_7] : memref<8x32xf32, #tpu.memory_space<vmem>>, vector<8x32xf32>
      %cst = arith.constant 1.000000e-01 : f32
      %13 = vector.broadcast %cst : f32 to vector<8x32xf32>
      %14 = arith.mulf %12, %13 : vector<8x32xf32>
      %c0_8 = arith.constant 0 : index
      %c0_9 = arith.constant 0 : index
      %15 = vector.load %arg5[%c0_8, %c0_9] : memref<8x32xf32, #tpu.memory_space<vmem>>, vector<8x32xf32>
      tpu.vector_store %arg5[%c0_8, %c0_9], %14 {strides = array<i32>} : memref<8x32xf32, #tpu.memory_space<vmem>>, vector<8x32xf32>,
      %c0_10 = arith.constant 0 : index
      %c0_11 = arith.constant 0 : index
      %16 = vector.load %arg3[%c0_10, %c0_11] : memref<32x32xf32, #tpu.memory_space<vmem>>, vector<32x32xf32>
      %cst_12 = arith.constant dense<0.000000e+00> : vector<8x32xf32>
      %17 = tpu.matmul %14, %16, %cst_12 {dimension_numbers = #tpu.dot_dimension_numbers<[1], [0], [0], [1], [0, 0, 1, 1], [], []>} : vector<8x32xf32>, vector<32x32xf32>, vector<8x32xf32> -> vector<8x32xf32>
      %cst_13 = arith.constant 0.000000e+00 : f32
      %18 = vector.broadcast %cst_13 : f32 to vector<8x32xf32>
      %19 = arith.maximumf %17, %18 : vector<8x32xf32>
      %c0_14 = arith.constant 0 : index
      %c0_15 = arith.constant 0 : index
      %20 = vector.load %arg4[%c0_14, %c0_15] : memref<32x16xf32, #tpu.memory_space<vmem>>, vector<32x16xf32>
      %cst_16 = arith.constant dense<0.000000e+00> : vector<8x16xf32>
      %21 = tpu.matmul %19, %20, %cst_16 {dimension_numbers = #tpu.dot_dimension_numbers<[1], [0], [0], [1], [0, 0, 1, 1], [], []>} : vector<8x32xf32>, vector<32x16xf32>, vector<8x16xf32> -> vector<8x16xf32>
      %c0_17 = arith.constant 0 : index
      %c0_18 = arith.constant 0 : index
      %22 = vector.load %arg6[%c0_17, %c0_18] : memref<8x16xf32, #tpu.memory_space<vmem>>, vector<8x16xf32>
      tpu.vector_store %arg6[%c0_17, %c0_18], %21 {strides = array<i32>} : memref<8x16xf32, #tpu.memory_space<vmem>>, vector<8x16xf32>,
    } else {
    }
    return
  }
  func.func @transform_0(%arg0: i32, %arg1: i32) -> (i32, i32, i32) {
    %c0_i32 = arith.constant 0 : i32
    %c0_i32_0 = arith.constant 0 : i32
    return %arg0, %arg1, %c0_i32 : i32, i32, i32
  }
  func.func @transform_1(%arg0: i32, %arg1: i32) -> (i32, i32) {
    %c0_i32 = arith.constant 0 : i32
    %c0_i32_0 = arith.constant 0 : i32
    %c0_i32_1 = arith.constant 0 : i32
    return %c0_i32, %c0_i32_0 : i32, i32
  }
  func.func @transform_2(%arg0: i32, %arg1: i32) -> (i32, i32) {
    %c0_i32 = arith.constant 0 : i32
    %c0_i32_0 = arith.constant 0 : i32
    %c0_i32_1 = arith.constant 0 : i32
    return %c0_i32, %c0_i32_0 : i32, i32
  }
  func.func @transform_3(%arg0: i32, %arg1: i32) -> (i32, i32) {
    %c0_i32 = arith.constant 0 : i32
    %c0_i32_0 = arith.constant 0 : i32
    return %arg0, %c0_i32 : i32, i32
  }
  func.func @transform_4(%arg0: i32, %arg1: i32) -> (i32, i32) {
    %c0_i32 = arith.constant 0 : i32
    %c0_i32_0 = arith.constant 0 : i32
    return %arg0, %c0_i32 : i32, i32
  }
}

</mosaic_0001>

<bundles_post_ra>
// kernel: tpu_custom_call.1
= control target key start
LH: loop header
LB: loop body
LE: loop exit
PB: predicated region body
PF: predicated region fallthrough
CT: control target
= control target key end

     0   :  { %10 = vsyncpa [#allocation4], 0  ;;  %s547_s0 = inlined_call_operand.vmem [shape: f32[4,10,32], index: 0, kind: input, shape index: {}]   ;;  %s548_s1 = inlined_call_operand.vmem [shape: f32[32,32], index: 1, kind: input, shape index: {}]   ;;  %s549_s2 = inlined_call_operand.vmem [shape: f32[32,16], index: 2, kind: input, shape index: {}]   ;;  %s550_s3 = inlined_call_operand.hbm [shape: f32[4,32], index: 3, kind: output, shape index: {0}]   ;;  %s551_s4 = inlined_call_operand.hbm [shape: f32[4,16], index: 4, kind: output, shape index: {1}]  }
   0x1   :  { %11 = vsyncpa [#allocation6], 0  ;;  %v268_v0 = vld [vmem:[%s548_s1 + $0x18] sm:$0xff]  ;;  %v267_v1 = vld [vmem:[%s548_s1 + $0x10] sm:$0xff]  ;;  %vm22_vm0 = vcmask 261120   ;;  %v417_v3 = vmov 0.0  }
   0x2   :  { %284 = vmatpush.msra.mxu0 %v268_v0  ;;  %v266_v2 = vld [vmem:[%s548_s1 + $0x8] sm:$0xff]  ;;  %23 = vst.msk [vmem:[#allocation2] sm:$0xff] %vm22_vm0, %v417_v3  ;;  %v147_v4 = vld [vmem:[%s547_s0] sm:$0xff]  ;;  %vm165_vm1 = vcmask 254976   ;;  %v149_v6 = vld [vmem:[%s547_s0 + $0x10] sm:$0xff]  ;;  %vm245_vm2 = vcmask 1041409  }
   0x3   :  { %v148_v5 = vld [vmem:[%s547_s0 + $0x8] sm:$0x3]  ;;  %v150_v7 = vld [vmem:[%s547_s0 + $0x18] sm:$0x3]  ;;  %v164_v8 = vsel %vm22_vm0, %v147_v4, 0.0  ;;  %v265_v9 = vld [vmem:[%s548_s1] sm:$0xff] }
   0x4   :  { %285 = vmatpush.msra.mxu0 %v267_v1  ;;  %v151_v10 = vld [vmem:[%s547_s0 + $0x20] sm:$0xff]  ;;  %v152_v11 = vld [vmem:[%s547_s0 + $0x28] sm:$0x3]  ;;  %v166_v12 = vsel %vm165_vm1, %v148_v5, 0.0  ;;  %v174_v13 = vsel %vm22_vm0, %v149_v6, 0.0  ;;  %v153_v14 = vld [vmem:[%s547_s0 + $0x30] sm:$0xff] }
   0x5   :  { %v154_v15 = vld [vmem:[%s547_s0 + $0x38] sm:$0x3]  ;;  %v155_v16 = vld [vmem:[%s547_s0 + $0x40] sm:$0xff]  ;;  %v167_v17 = vadd.f32 %v166_v12, %v164_v8  ;;  %v175_v18 = vsel %vm165_vm1, %v150_v7, 0.0  ;;  %v156_v19 = vld [vmem:[%s547_s0 + $0x48] sm:$0x3] }
   0x6   :  { %286 = vmatpush.msra.mxu0 %v266_v2  ;;  %v176_v20 = vadd.f32 %v175_v18, %v174_v13  ;;  %v183_v21 = vsel %vm22_vm0, %v151_v10, 0.0  ;;  %v184_v22 = vsel %vm165_vm1, %v152_v11, 0.0  ;;  %v157_v23 = vld [vmem:[%s547_s0 + $0x50] sm:$0xff]  ;;  %v158_v24 = vld [vmem:[%s547_s0 + $0x58] sm:$0x3]  ;;  %v192_v28 = vsel %vm22_vm0, %v153_v14, 0.0 }
   0x7   :  { %v168_v25 = vrot.slane %v167_v17, 4  ;;  %v185_v26 = vadd.f32 %v184_v22, %v183_v21  ;;  %v193_v29 = vsel %vm165_vm1, %v154_v15, 0.0  ;;  %v201_v30 = vsel %vm22_vm0, %v155_v16, 0.0  ;;  %v159_v31 = vld [vmem:[%s547_s0 + $0x60] sm:$0xff]  ;;  %v160_v32 = vld [vmem:[%s547_s0 + $0x68] sm:$0x3] }
   0x8   :  { %287 = vmatpush.msra.mxu0 %v265_v9  ;;  %v177_v27 = vrot.slane %v176_v20, 4  ;;  %v194_v35 = vadd.f32 %v193_v29, %v192_v28  ;;  %v202_v36 = vsel %vm165_vm1, %v156_v19, 0.0  ;;  %v210_v39 = vsel %vm22_vm0, %v157_v23, 0.0  ;;  %v161_v41 = vld [vmem:[%s547_s0 + $0x70] sm:$0xff]  ;;  %v162_v50 = vld [vmem:[%s547_s0 + $0x78] sm:$0x3] }
   0x9   :  { %v169_v33 = vadd.f32 %v168_v25, %v167_v17  ;;  %v186_v34 = vrot.slane %v185_v26, 4  ;;  %v203_v38 = vadd.f32 %v202_v36, %v201_v30  ;;  %v211_v40 = vsel %vm165_vm1, %v158_v24, 0.0  ;;  %v296_v55 = vld [vmem:[%s549_s2 + $0x18] sm:$0xff]  ;;  %v295_v56 = vld [vmem:[%s549_s2 + $0x10] sm:$0xff]  ;;  %v146_v36 = vld [vmem:[#allocation2] sm:$0xff] }
   0xa   :  { %v178_v37 = vadd.f32 %v177_v27, %v176_v20  ;;  %v195_v44 = vrot.slane %v194_v35, 4  ;;  %v212_v45 = vadd.f32 %v211_v40, %v210_v39  ;;  %v219_v48 = vsel %vm22_vm0, %v159_v31, 0.0  ;;  %312 = vmatpush.msra.mxu1 %v296_v55 }
   0xb   :  { %v170_v42 = vrot.slane %v169_v33, 2  ;;  %v187_v43 = vadd.f32 %v186_v34, %v185_v26  ;;  %v204_v47 = vrot.slane %v203_v38, 4  ;;  %v220_v49 = vsel %vm165_vm1, %v160_v32, 0.0 }
   0xc   :  { %v179_v46 = vrot.slane %v178_v37, 2  ;;  %v196_v53 = vadd.f32 %v195_v44, %v194_v35  ;;  %v213_v54 = vrot.slane %v212_v45, 4  ;;  %v221_v59 = vadd.f32 %v220_v49, %v219_v48  ;;  %313 = vmatpush.msra.mxu1 %v295_v56 }
   0xd   :  { %v171_v51 = vadd.f32 %v170_v42, %v169_v33  ;;  %v188_v52 = vrot.slane %v187_v43, 2  ;;  %v205_v58 = vadd.f32 %v204_v47, %v203_v38  ;;  %v228_v60 = vsel %vm22_vm0, %v161_v41, 0.0  ;;  %v294_v42 = vld [vmem:[%s549_s2 + $0x8] sm:$0xff] }
   0xe   :  { %v180_v57 = vadd.f32 %v179_v46, %v178_v37  ;;  %v197_v63 = vrot.slane %v196_v53, 2  ;;  %v214_v0 = vadd.f32 %v213_v54, %v212_v45  ;;  %v222_v3 = vrot.slane %v221_v59, 4  ;;  %314 = vmatpush.msra.mxu1 %v294_v42 }
   0xf   :  { %v172_v61 = vrot.slane %v171_v51, 1  ;;  %v189_v62 = vadd.f32 %v188_v52, %v187_v43  ;;  %v206_v2 = vrot.slane %v205_v58, 2  ;;  %v229_v4 = vsel %vm165_vm1, %v162_v50, 0.0  ;;  %v293_v43 = vld [vmem:[%s549_s2] sm:$0xff] }
  0x10   :  { %v181_v1 = vrot.slane %v180_v57, 1  ;;  %v198_v7 = vadd.f32 %v197_v63, %v196_v53  ;;  %v215_v8 = vrot.slane %v214_v0, 2  ;;  %v223_v11 = vadd.f32 %v222_v3, %v221_v59  ;;  %315 = vmatpush.msra.mxu1 %v293_v43 }
  0x11   :  { %v173_v5 = vadd.f32 %v172_v61, %v171_v51  ;;  %v190_v6 = vrot.slane %v189_v62, 1  ;;  %v207_v10 = vadd.f32 %v206_v2, %v205_v58  ;;  %v230_v12 = vadd.f32 %v229_v4, %v228_v60 }
  0x12   :  { %v182_v9 = vadd.f32 %v181_v1, %v180_v57  ;;  %v199_v14 = vrot.slane %v198_v7, 1  ;;  %v216_v15 = vadd.f32 %v215_v8, %v214_v0  ;;  %vm247_vm3 = vcmask 1042434  }
  0x13   :  { %v191_v13 = vadd.f32 %v190_v6, %v189_v62  ;;  %v208_v16 = vrot.slane %v207_v10, 1  ;;  %v224_v17 = vrot.slane %v223_v11, 2  ;;  %v231_v18 = vrot.slane %v230_v12, 4 }
  0x14   :  { %v246_v19 = vsel %vm245_vm2, %v182_v9, %v173_v5  ;;  %v200_v20 = vadd.f32 %v199_v14, %v198_v7  ;;  %v217_v21 = vrot.slane %v216_v15, 1  ;;  %vm249_vm4 = vcmask 1043459  }
  0x15   :  { %v248_v22 = vsel %vm247_vm3, %v191_v13, %v246_v19  ;;  %v209_v23 = vadd.f32 %v208_v16, %v207_v10  ;;  %v225_v24 = vadd.f32 %v224_v17, %v223_v11  ;;  %v232_v25 = vadd.f32 %v231_v18, %v230_v12 }
  0x16   :  { %vm251_vm5 = vcmask 1044484   ;;  %v218_v26 = vadd.f32 %v217_v21, %v216_v15  ;;  %v250_v27 = vsel %vm249_vm4, %v200_v20, %v248_v22  ;;  %vm253_vm6 = vcmask 1045509  }
  0x17   :  { %v226_v28 = vrot.slane %v225_v24, 1  ;;  %v233_v29 = vrot.slane %v232_v25, 2  ;;  %v252_v30 = vsel %vm251_vm5, %v209_v23, %v250_v27  ;;  %vm255_vm7 = vcmask 1046534  }
  0x18   :  { %v254_v33 = vsel %vm253_vm6, %v218_v26, %v252_v30  ;;  %vm257_vm8 = vcmask 1047559   ;;  %vm320_vm9 = vcmask 130048  }
  0x19   :  { %v227_v31 = vadd.f32 %v226_v28, %v225_v24  ;;  %v234_v32 = vadd.f32 %v233_v29, %v232_v25 }
  0x1b   :  { %v235_v34 = vrot.slane %v234_v32, 1  ;;  %v256_v35 = vsel %vm255_vm7, %v227_v31, %v254_v33 }
  0x1d   :  { %v236_v37 = vadd.f32 %v235_v34, %v234_v32 }
  0x1f   :  { %v258_v38 = vsel %vm257_vm8, %v236_v37, %v256_v35 }
  0x20   :  { %v260_v39 = vadd.f32 %v258_v38, %v146_v36 }
  0x22   :  { %261 = vst.msk [vmem:[#allocation2] sm:$0xff] %vm22_vm0, %v260_v39 }
  0x29   :  { %v262_v40 = vld [vmem:[#allocation2] sm:$0xff] }
  0x2a   :  { %v263_v41 = vmul.f32 0.1, %v262_v40 }
  0x2c   :  { %264 = vst.msk [vmem:[#allocation3] sm:$0xff] %vm22_vm0, %v263_v41  ;;  %358 = vmatmul.msk.f32.vlgmr.msra.gmra.mxu0 %vm22_vm0, %v263_v41 }
  0xa9   :  { %v289_v44 = vpop.f32.mrf.mxu0 }
  0xaa   :  { %v292_v45 = vmax.f32 %v289_v44, 0.0 }
  0xac   :  { %359 = vmatmul.msk.f32.vlgmr.msra.gmra.mxu1 %vm22_vm0, %v292_v45 }
 0x129   :  { %v317_v46 = vpop.f32.mrf.mxu1 }
 0x12a   :  { %321 = vst.msk [vmem:[#allocation5] sm:$0xff] %vm320_vm9, %v317_v46 }
 0x12b   :  { %325 = vsyncadd [#allocation4], 64  ;;  %s328_s11 = sshll.u32 %s550_s3, 4  ;;  %s418_s12 = smov [#allocation3]   ;;  %s329_s11 = int_to_ptr.hbm [resolvable:$true] %s328_s11 }
 0x12c   :  { %s326_s1 = sshll.u32 %s418_s12, 4  ;;  %s419_s13 = smov 64   ;;  %s327_s1 = int_to_ptr.vmem [resolvable:$true] %s326_s1 }
 0x12d   :  { %s420_s14 = smov 4  }
 0x12e   :  { %334 = dma.vmem_to_hbm [thread:$0]  %s327_s1, 64, %s329_s11, [#allocation4], %s419_s13, %s419_s13, %s420_s14  }
 0x12f   :  { %338 = vsyncadd [#allocation6], 64  ;;  %s341_s16 = sshll.u32 %s551_s4, 4  ;;  %s421_s17 = smov [#allocation5]   ;;  %s342_s16 = int_to_ptr.hbm [resolvable:$true] %s341_s16 }
 0x130   :  { %s339_s18 = sshll.u32 %s421_s17, 4  ;;  %s340_s18 = int_to_ptr.vmem [resolvable:$true] %s339_s18 }
 0x131   :  { %347 = dma.vmem_to_hbm [thread:$0]  %s340_s18, 64, %s342_s16, [#allocation6], %s419_s13, %s419_s13, %s420_s14  }
 0x132   :  { %413 = dma.done.wait [#allocation4], 128  }
 0x133   :  { %414 = vsyncadd [#allocation4], 4294967168 }
 0x134   :  { %415 = dma.done.wait [#allocation6], 128  }
 0x135   :  { %416 = vsyncadd [#allocation6], 4294967168 }
 0x136   :  { %356 = vsyncpa [#allocation4], 1 }
 0x137   :  { %357 = vsyncpa [#allocation6], 1 }

// kernel: tpu_custom_call.1
= control target key start
LH: loop header
LB: loop body
LE: loop exit
PB: predicated region body
PF: predicated region fallthrough
CT: control target
= control target key end

     0   :  { %10 = vsyncpa [#allocation4], 0  ;;  %s547_s0 = inlined_call_operand.vmem [shape: f32[4,10,32], index: 0, kind: input, shape index: {}]   ;;  %s548_s1 = inlined_call_operand.vmem [shape: f32[32,32], index: 1, kind: input, shape index: {}]   ;;  %s549_s2 = inlined_call_operand.vmem [shape: f32[32,16], index: 2, kind: input, shape index: {}]   ;;  %s550_s3 = inlined_call_operand.hbm [shape: f32[4,32], index: 3, kind: output, shape index: {0}]   ;;  %s551_s4 = inlined_call_operand.hbm [shape: f32[4,16], index: 4, kind: output, shape index: {1}]  }
   0x1   :  { %11 = vsyncpa [#allocation6], 0  ;;  %v268_v0 = vld [vmem:[%s548_s1 + $0x18] sm:$0xff]  ;;  %v267_v1 = vld [vmem:[%s548_s1 + $0x10] sm:$0xff]  ;;  %vm22_vm0 = vcmask 261120   ;;  %v417_v3 = vmov 0.0  }
   0x2   :  { %284 = vmatpush.msra.mxu0 %v268_v0  ;;  %v266_v2 = vld [vmem:[%s548_s1 + $0x8] sm:$0xff]  ;;  %23 = vst.msk [vmem:[#allocation2] sm:$0xff] %vm22_vm0, %v417_v3  ;;  %v147_v4 = vld [vmem:[%s547_s0] sm:$0xff]  ;;  %vm165_vm1 = vcmask 254976   ;;  %v149_v6 = vld [vmem:[%s547_s0 + $0x10] sm:$0xff]  ;;  %vm245_vm2 = vcmask 1041409  }
   0x3   :  { %v148_v5 = vld [vmem:[%s547_s0 + $0x8] sm:$0x3]  ;;  %v150_v7 = vld [vmem:[%s547_s0 + $0x18] sm:$0x3]  ;;  %v164_v8 = vsel %vm22_vm0, %v147_v4, 0.0  ;;  %v265_v9 = vld [vmem:[%s548_s1] sm:$0xff] }
   0x4   :  { %285 = vmatpush.msra.mxu0 %v267_v1  ;;  %v151_v10 = vld [vmem:[%s547_s0 + $0x20] sm:$0xff]  ;;  %v152_v11 = vld [vmem:[%s547_s0 + $0x28] sm:$0x3]  ;;  %v166_v12 = vsel %vm165_vm1, %v148_v5, 0.0  ;;  %v174_v13 = vsel %vm22_vm0, %v149_v6, 0.0  ;;  %v153_v14 = vld [vmem:[%s547_s0 + $0x30] sm:$0xff] }
   0x5   :  { %v154_v15 = vld [vmem:[%s547_s0 + $0x38] sm:$0x3]  ;;  %v155_v16 = vld [vmem:[%s547_s0 + $0x40] sm:$0xff]  ;;  %v167_v17 = vadd.f32 %v166_v12, %v164_v8  ;;  %v175_v18 = vsel %vm165_vm1, %v150_v7, 0.0  ;;  %v156_v19 = vld [vmem:[%s547_s0 + $0x48] sm:$0x3] }
   0x6   :  { %286 = vmatpush.msra.mxu0 %v266_v2  ;;  %v176_v20 = vadd.f32 %v175_v18, %v174_v13  ;;  %v183_v21 = vsel %vm22_vm0, %v151_v10, 0.0  ;;  %v184_v22 = vsel %vm165_vm1, %v152_v11, 0.0  ;;  %v157_v23 = vld [vmem:[%s547_s0 + $0x50] sm:$0xff]  ;;  %v158_v24 = vld [vmem:[%s547_s0 + $0x58] sm:$0x3]  ;;  %v192_v28 = vsel %vm22_vm0, %v153_v14, 0.0 }
   0x7   :  { %v168_v25 = vrot.slane %v167_v17, 4  ;;  %v185_v26 = vadd.f32 %v184_v22, %v183_v21  ;;  %v193_v29 = vsel %vm165_vm1, %v154_v15, 0.0  ;;  %v201_v30 = vsel %vm22_vm0, %v155_v16, 0.0  ;;  %v159_v31 = vld [vmem:[%s547_s0 + $0x60] sm:$0xff]  ;;  %v160_v32 = vld [vmem:[%s547_s0 + $0x68] sm:$0x3] }
   0x8   :  { %287 = vmatpush.msra.mxu0 %v265_v9  ;;  %v177_v27 = vrot.slane %v176_v20, 4  ;;  %v194_v35 = vadd.f32 %v193_v29, %v192_v28  ;;  %v202_v36 = vsel %vm165_vm1, %v156_v19, 0.0  ;;  %v210_v39 = vsel %vm22_vm0, %v157_v23, 0.0  ;;  %v161_v41 = vld [vmem:[%s547_s0 + $0x70] sm:$0xff]  ;;  %v162_v50 = vld [vmem:[%s547_s0 + $0x78] sm:$0x3] }
   0x9   :  { %v169_v33 = vadd.f32 %v168_v25, %v167_v17  ;;  %v186_v34 = vrot.slane %v185_v26, 4  ;;  %v203_v38 = vadd.f32 %v202_v36, %v201_v30  ;;  %v211_v40 = vsel %vm165_vm1, %v158_v24, 0.0  ;;  %v296_v55 = vld [vmem:[%s549_s2 + $0x18] sm:$0xff]  ;;  %v295_v56 = vld [vmem:[%s549_s2 + $0x10] sm:$0xff]  ;;  %v146_v36 = vld [vmem:[#allocation2] sm:$0xff] }
   0xa   :  { %v178_v37 = vadd.f32 %v177_v27, %v176_v20  ;;  %v195_v44 = vrot.slane %v194_v35, 4  ;;  %v212_v45 = vadd.f32 %v211_v40, %v210_v39  ;;  %v219_v48 = vsel %vm22_vm0, %v159_v31, 0.0  ;;  %312 = vmatpush.msra.mxu1 %v296_v55 }
   0xb   :  { %v170_v42 = vrot.slane %v169_v33, 2  ;;  %v187_v43 = vadd.f32 %v186_v34, %v185_v26  ;;  %v204_v47 = vrot.slane %v203_v38, 4  ;;  %v220_v49 = vsel %vm165_vm1, %v160_v32, 0.0 }
   0xc   :  { %v179_v46 = vrot.slane %v178_v37, 2  ;;  %v196_v53 = vadd.f32 %v195_v44, %v194_v35  ;;  %v213_v54 = vrot.slane %v212_v45, 4  ;;  %v221_v59 = vadd.f32 %v220_v49, %v219_v48  ;;  %313 = vmatpush.msra.mxu1 %v295_v56 }
   0xd   :  { %v171_v51 = vadd.f32 %v170_v42, %v169_v33  ;;  %v188_v52 = vrot.slane %v187_v43, 2  ;;  %v205_v58 = vadd.f32 %v204_v47, %v203_v38  ;;  %v228_v60 = vsel %vm22_vm0, %v161_v41, 0.0  ;;  %v294_v42 = vld [vmem:[%s549_s2 + $0x8] sm:$0xff] }
   0xe   :  { %v180_v57 = vadd.f32 %v179_v46, %v178_v37  ;;  %v197_v63 = vrot.slane %v196_v53, 2  ;;  %v214_v0 = vadd.f32 %v213_v54, %v212_v45  ;;  %v222_v3 = vrot.slane %v221_v59, 4  ;;  %314 = vmatpush.msra.mxu1 %v294_v42 }
   0xf   :  { %v172_v61 = vrot.slane %v171_v51, 1  ;;  %v189_v62 = vadd.f32 %v188_v52, %v187_v43  ;;  %v206_v2 = vrot.slane %v205_v58, 2  ;;  %v229_v4 = vsel %vm165_vm1, %v162_v50, 0.0  ;;  %v293_v43 = vld [vmem:[%s549_s2] sm:$0xff] }
  0x10   :  { %v181_v1 = vrot.slane %v180_v57, 1  ;;  %v198_v7 = vadd.f32 %v197_v63, %v196_v53  ;;  %v215_v8 = vrot.slane %v214_v0, 2  ;;  %v223_v11 = vadd.f32 %v222_v3, %v221_v59  ;;  %315 = vmatpush.msra.mxu1 %v293_v43 }
  0x11   :  { %v173_v5 = vadd.f32 %v172_v61, %v171_v51  ;;  %v190_v6 = vrot.slane %v189_v62, 1  ;;  %v207_v10 = vadd.f32 %v206_v2, %v205_v58  ;;  %v230_v12 = vadd.f32 %v229_v4, %v228_v60 }
  0x12   :  { %v182_v9 = vadd.f32 %v181_v1, %v180_v57  ;;  %v199_v14 = vrot.slane %v198_v7, 1  ;;  %v216_v15 = vadd.f32 %v215_v8, %v214_v0  ;;  %vm247_vm3 = vcmask 1042434  }
  0x13   :  { %v191_v13 = vadd.f32 %v190_v6, %v189_v62  ;;  %v208_v16 = vrot.slane %v207_v10, 1  ;;  %v224_v17 = vrot.slane %v223_v11, 2  ;;  %v231_v18 = vrot.slane %v230_v12, 4 }
  0x14   :  { %v246_v19 = vsel %vm245_vm2, %v182_v9, %v173_v5  ;;  %v200_v20 = vadd.f32 %v199_v14, %v198_v7  ;;  %v217_v21 = vrot.slane %v216_v15, 1  ;;  %vm249_vm4 = vcmask 1043459  }
  0x15   :  { %v248_v22 = vsel %vm247_vm3, %v191_v13, %v246_v19  ;;  %v209_v23 = vadd.f32 %v208_v16, %v207_v10  ;;  %v225_v24 = vadd.f32 %v224_v17, %v223_v11  ;;  %v232_v25 = vadd.f32 %v231_v18, %v230_v12 }
  0x16   :  { %vm251_vm5 = vcmask 1044484   ;;  %v218_v26 = vadd.f32 %v217_v21, %v216_v15  ;;  %v250_v27 = vsel %vm249_vm4, %v200_v20, %v248_v22  ;;  %vm253_vm6 = vcmask 1045509  }
  0x17   :  { %v226_v28 = vrot.slane %v225_v24, 1  ;;  %v233_v29 = vrot.slane %v232_v25, 2  ;;  %v252_v30 = vsel %vm251_vm5, %v209_v23, %v250_v27  ;;  %vm255_vm7 = vcmask 1046534  }
  0x18   :  { %v254_v33 = vsel %vm253_vm6, %v218_v26, %v252_v30  ;;  %vm257_vm8 = vcmask 1047559   ;;  %vm320_vm9 = vcmask 130048  }
  0x19   :  { %v227_v31 = vadd.f32 %v226_v28, %v225_v24  ;;  %v234_v32 = vadd.f32 %v233_v29, %v232_v25 }
  0x1b   :  { %v235_v34 = vrot.slane %v234_v32, 1  ;;  %v256_v35 = vsel %vm255_vm7, %v227_v31, %v254_v33 }
  0x1d   :  { %v236_v37 = vadd.f32 %v235_v34, %v234_v32 }
  0x1f   :  { %v258_v38 = vsel %vm257_vm8, %v236_v37, %v256_v35 }
  0x20   :  { %v260_v39 = vadd.f32 %v258_v38, %v146_v36 }
  0x22   :  { %261 = vst.msk [vmem:[#allocation2] sm:$0xff] %vm22_vm0, %v260_v39 }
  0x29   :  { %v262_v40 = vld [vmem:[#allocation2] sm:$0xff] }
  0x2a   :  { %v263_v41 = vmul.f32 0.1, %v262_v40 }
  0x2c   :  { %264 = vst.msk [vmem:[#allocation3] sm:$0xff] %vm22_vm0, %v263_v41  ;;  %358 = vmatmul.msk.f32.vlgmr.msra.gmra.mxu0 %vm22_vm0, %v263_v41 }
  0xa9   :  { %v289_v44 = vpop.f32.mrf.mxu0 }
  0xaa   :  { %v292_v45 = vmax.f32 %v289_v44, 0.0 }
  0xac   :  { %359 = vmatmul.msk.f32.vlgmr.msra.gmra.mxu1 %vm22_vm0, %v292_v45 }
 0x129   :  { %v317_v46 = vpop.f32.mrf.mxu1 }
 0x12a   :  { %321 = vst.msk [vmem:[#allocation5] sm:$0xff] %vm320_vm9, %v317_v46 }
 0x12b   :  { %325 = vsyncadd [#allocation4], 64  ;;  %s328_s11 = sshll.u32 %s550_s3, 4  ;;  %s418_s12 = smov [#allocation3]   ;;  %s329_s11 = int_to_ptr.hbm [resolvable:$true] %s328_s11 }
 0x12c   :  { %s326_s1 = sshll.u32 %s418_s12, 4  ;;  %s419_s13 = smov 64   ;;  %s327_s1 = int_to_ptr.vmem [resolvable:$true] %s326_s1 }
 0x12d   :  { %s420_s14 = smov 4  }
 0x12e   :  { %334 = dma.vmem_to_hbm [thread:$0]  %s327_s1, 64, %s329_s11, [#allocation4], %s419_s13, %s419_s13, %s420_s14  }
 0x12f   :  { %338 = vsyncadd [#allocation6], 64  ;;  %s341_s16 = sshll.u32 %s551_s4, 4  ;;  %s421_s17 = smov [#allocation5]   ;;  %s342_s16 = int_to_ptr.hbm [resolvable:$true] %s341_s16 }
 0x130   :  { %s339_s18 = sshll.u32 %s421_s17, 4  ;;  %s340_s18 = int_to_ptr.vmem [resolvable:$true] %s339_s18 }
 0x131   :  { %347 = dma.vmem_to_hbm [thread:$0]  %s340_s18, 64, %s342_s16, [#allocation6], %s419_s13, %s419_s13, %s420_s14  }
 0x132   :  { %413 = dma.done.wait [#allocation4], 128  }
 0x133   :  { %414 = vsyncadd [#allocation4], 4294967168 }
 0x134   :  { %415 = dma.done.wait [#allocation6], 128  }
 0x135   :  { %416 = vsyncadd [#allocation6], 4294967168 }
 0x136   :  { %356 = vsyncpa [#allocation4], 1 }
 0x137   :  { %357 = vsyncpa [#allocation6], 1 }

</bundles_post_ra>
